<compile_context>
chip_gen: v7x
topology: tpu7x:2x2x1
jax: 0.10.0
libtpu: 0.0.40
codegen_flags: <defaults>
</compile_context>

<pallas_src>
import functools

import jax
import jax.numpy as jnp
from jax.experimental import pallas as pl
from jax.experimental.pallas import tpu as pltpu

# fix "method" enum values, as in nics_fix_pt
FIX_NONE = 0
FIX_AUTO = 1
FIX_FIXED = 2

_EPS = 1e-5

_LANE = 512           # lane-dense last dim (multiple of 128) -> unmasked full-lane stores
_MAX_TILE_ROWS = 512  # 512x512 f32 tile = 1 MiB/buffer; safe on v5e/v6e/v7x VMEM
_VMEM_LIMIT = 32 * 1024 * 1024


def _cdiv(a, b):
    return -(-a // b)


def _round_up(a, b):
    return _cdiv(a, b) * b


def _layout_2d(x):
    """Flatten to a zero-padded, lane/sublane-dense (padded_rows, _LANE) slab.

    Zero padding is safe: it cannot change max(|x|) (|x| >= 0) and padded
    outputs are sliced off before reshaping back.
    Rows are spread evenly over the grid so tiles stay balanced and padding
    waste is at most ~8 rows per grid step.
    """
    total = x.size
    rows = max(_cdiv(total, _LANE), 1)
    rows = _round_up(rows, 8)                       # sublane-dense
    grid_n = _cdiv(rows, _MAX_TILE_ROWS)
    block_rows = _round_up(_cdiv(rows, grid_n), 8)  # <= _MAX_TILE_ROWS, multiple of 8
    padded_rows = block_rows * grid_n
    padded_total = padded_rows * _LANE

    flat = x.reshape(-1)
    if padded_total != total:
        flat = jnp.pad(flat, (0, padded_total - total))
    x2d = flat.reshape(padded_rows, _LANE)
    return x2d, total, block_rows, grid_n


# ---------------------------------------------------------------------------
# Kernels
# ---------------------------------------------------------------------------
def _maxabs_kernel(x_ref, m_ref):
    """Pass 1: tiled running max-|x| reduction (grid axis is 'arbitrary').

    The (1, _LANE) output block has a constant index map, so it stays resident
    in VMEM across the grid and acts as the lane-wise running-max accumulator.
    """
    i = pl.program_id(0)
    tile_max = jnp.max(jnp.abs(x_ref[...].astype(jnp.float32)), axis=0, keepdims=True)

    @pl.when(i == 0)
    def _():
        m_ref[...] = tile_max

    @pl.when(i > 0)
    def _():
        m_ref[...] = jnp.maximum(m_ref[...], tile_max)


def _quant_kernel(params_ref, x_ref, o_ref):
    """Pass 2: tiled elementwise quantize; constants come in via SMEM.

    params = [step, inv_step, minimum, maximum]; inv_step is the exact
    power-of-two inverse so the per-element divide becomes a VALU multiply.
    """
    step = params_ref[0]
    inv_step = params_ref[1]
    minimum = params_ref[2]
    maximum = params_ref[3]
    x = x_ref[...].astype(jnp.float32)
    q = jnp.round(x * inv_step) * step
    q = jnp.minimum(jnp.maximum(q, minimum), maximum)
    o_ref[...] = q.astype(o_ref.dtype)


def _fused_small_kernel(x_ref, o_ref, scale_ref, *, bitwidth):
    """Small-tensor fast path: whole (padded) tensor is one tile -> fuse both passes."""
    x = x_ref[...].astype(jnp.float32)
    max_abs = jnp.max(jnp.abs(x))
    new_scale = jnp.ceil(jnp.log2(jnp.maximum(max_abs, jnp.float32(_EPS))))
    bwm1 = jnp.float32(bitwidth - 1)
    step = jnp.exp2(new_scale - bwm1)
    inv_step = jnp.exp2(bwm1 - new_scale)
    minimum = -jnp.exp2(new_scale)
    maximum = -minimum - step
    q = jnp.minimum(jnp.maximum(jnp.round(x * inv_step) * step, minimum), maximum)
    o_ref[...] = q.astype(o_ref.dtype)
    scale_ref[0] = new_scale


# ---------------------------------------------------------------------------
# Host-side wrappers
# ---------------------------------------------------------------------------
def _quant_params(scale, bitwidth):
    """Scalar epilogue: derive [step, inv_step, minimum, maximum] from scale."""
    scale = jnp.asarray(scale, jnp.float32).reshape(())
    bwm1 = jnp.float32(bitwidth - 1)
    step = jnp.exp2(scale - bwm1)
    inv_step = jnp.exp2(bwm1 - scale)  # exact power-of-two inverse
    minimum = -jnp.exp2(scale)
    maximum = -minimum - step
    return jnp.stack([step, inv_step, minimum, maximum]).astype(jnp.float32)


def _quantize_pass(x2d, params, block_rows, grid_n, out_dtype):
    """Tiled, pipelined elementwise quantize ('parallel' -> megacore sharding)."""
    return pl.pallas_call(
        _quant_kernel,
        grid=(grid_n,),
        in_specs=[
            pl.BlockSpec(memory_space=pltpu.SMEM),                 # params (4,)
            pl.BlockSpec((block_rows, _LANE), lambda i: (i, 0)),   # x tiles
        ],
        out_specs=pl.BlockSpec((block_rows, _LANE), lambda i: (i, 0)),
        out_shape=jax.ShapeDtypeStruct(x2d.shape, out_dtype),
        compiler_params=pltpu.CompilerParams(
            dimension_semantics=("parallel",),
            vmem_limit_bytes=_VMEM_LIMIT,
        ),
    )(params, x2d)


def activation_fix_auto(x, *, bitwidth=8):
    """FIX_AUTO: recompute per-tensor scale, then quantize. Returns (q, scale[1])."""
    orig_shape = x.shape
    x2d, total, block_rows, grid_n = _layout_2d(x)

    if grid_n == 1:
        # Small-tensor fast path: single block (reduce + quantize fused).
        kernel = functools.partial(_fused_small_kernel, bitwidth=bitwidth)
        q2d, scale = pl.pallas_call(
            kernel,
            grid=(1,),
            in_specs=[pl.BlockSpec(x2d.shape, lambda i: (0, 0))],
            out_specs=(
                pl.BlockSpec(x2d.shape, lambda i: (0, 0)),
                pl.BlockSpec(memory_space=pltpu.SMEM),
            ),
            out_shape=(
                jax.ShapeDtypeStruct(x2d.shape, x.dtype),
                jax.ShapeDtypeStruct((1,), jnp.float32),
            ),
            compiler_params=pltpu.CompilerParams(
                dimension_semantics=("arbitrary",),
                vmem_limit_bytes=_VMEM_LIMIT,
            ),
        )(x2d)
        q = q2d.reshape(-1)[:total].reshape(orig_shape)
        return q, scale

    # Pass 1: tiled max-|x| reduction.
    maxabs_lane = pl.pallas_call(
        _maxabs_kernel,
        grid=(grid_n,),
        in_specs=[pl.BlockSpec((block_rows, _LANE), lambda i: (i, 0))],
        out_specs=pl.BlockSpec((1, _LANE), lambda i: (0, 0)),
        out_shape=jax.ShapeDtypeStruct((1, _LANE), jnp.float32),
        compiler_params=pltpu.CompilerParams(
            dimension_semantics=("arbitrary",),
            vmem_limit_bytes=_VMEM_LIMIT,
        ),
    )(x2d)

    # Tiny scalar epilogue outside the kernel (trivial, fused by XLA).
    max_abs = jnp.max(maxabs_lane)
    new_scale = jnp.ceil(jnp.log2(jnp.maximum(max_abs, jnp.float32(_EPS))))
    params = _quant_params(new_scale, bitwidth)

    # Pass 2: tiled quantize.
    q2d = _quantize_pass(x2d, params, block_rows, grid_n, x.dtype)
    q = q2d.reshape(-1)[:total].reshape(orig_shape)
    return q, new_scale.reshape((1,))


def activation_fix_fixed(x, scale, *, bitwidth=8):
    """FIX_FIXED: quantize with a user-supplied (fixed) scale; scale is not updated."""
    orig_shape = x.shape
    x2d, total, block_rows, grid_n = _layout_2d(x)
    params = _quant_params(scale, bitwidth)
    q2d = _quantize_pass(x2d, params, block_rows, grid_n, x.dtype)
    return q2d.reshape(-1)[:total].reshape(orig_shape)


class ActivationFix:
    """JAX/Pallas mirror of nics_fix_pt.fix_modules.Activation_fix (forward only)."""

    def __init__(self, **kwargs):
        assert "nf_fix_params" in kwargs and isinstance(kwargs["nf_fix_params"], dict), (
            "Must specify `nf_fix_params` keyword arguments, "
            "and `nf_fix_params_grad` is optional."
        )
        self.nf_fix_params = kwargs.pop("nf_fix_params")
        self.nf_fix_params_grad = kwargs.pop("nf_fix_params_grad", {})
        self.activation = None

    def __call__(self, inputs):
        if not isinstance(inputs, dict):
            inputs = {"input": inputs}
        x = inputs["input"]
        fix_cfg = self.nf_fix_params.get("activation", {})
        method = int(fix_cfg.get("method", FIX_NONE))
        bitwidth = int(fix_cfg.get("bitwidth", 8))

        if method == FIX_NONE:
            self.activation = x
        elif method == FIX_AUTO:
            q, new_scale = activation_fix_auto(x, bitwidth=bitwidth)
            # Mirrors the in-place scale-param update done by quantitize().
            # NOTE: this stores a traced value into Python state if called
            # under jax.jit; fine for eager module-style use as here.
            fix_cfg["scale"] = new_scale
            self.activation = q
        elif method == FIX_FIXED:
            scale = fix_cfg.get("scale", 0.0)
            self.activation = activation_fix_fixed(x, scale, bitwidth=bitwidth)
        else:
            raise ValueError("unknown fix method: %d" % method)
        # TODO(synk): nf_fix_params_grad (gradient/STE quantization config) is
        # not implemented — forward pass only.
        return self.activation


# ---------------------------------------------------------------------------
# Pure-JAX references (for validation)
# ---------------------------------------------------------------------------
def _reference_quant(x, scale, bitwidth=8):
    xf = x.astype(jnp.float32)
    step = jnp.exp2(scale - (bitwidth - 1))
    minimum = -jnp.exp2(scale)
    maximum = -minimum - step
    return jnp.clip(jnp.round(xf / step) * step, minimum, maximum).astype(x.dtype)


def _reference_auto(x, bitwidth=8):
    xf = x.astype(jnp.float32)
    scale = jnp.ceil(jnp.log2(jnp.maximum(jnp.max(jnp.abs(xf)), _EPS)))
    return _reference_quant(x, scale, bitwidth), scale


if __name__ == "__main__":
    key = jax.random.PRNGKey(0)
    k1, k2, k3 = jax.random.split(key, 3)

    nf_fix_params = {"activation": {"method": FIX_AUTO, "bitwidth": 8, "scale": 0.0}}
    module = ActivationFix(nf_fix_params=nf_fix_params)

    # 1) Small NCHW activation -> fused single-block fast path.
    x_small = jax.random.normal(k1, (2, 4, 16, 16), dtype=jnp.float32) * 3.0
    out_small = jax.block_until_ready(module(x_small))
    ref_small, ref_scale_small = _reference_auto(x_small, bitwidth=8)
    assert out_small.shape == x_small.shape and out_small.dtype == x_small.dtype
    assert jnp.allclose(out_small, ref_small, atol=1e-6, rtol=1e-6), "small: mismatch"
    assert jnp.allclose(module.nf_fix_params["activation"]["scale"][0], ref_scale_small)

    # 2) Larger activation with a non-tile-multiple element count
    #    -> tiled two-pass (reduce + quantize) path with zero padding.
    x_big = jax.random.normal(k2, (4, 16, 65, 65), dtype=jnp.float32) * 1.7
    out_big = jax.block_until_ready(module(x_big))
    ref_big, ref_scale_big = _reference_auto(x_big, bitwidth=8)
    assert out_big.shape == x_big.shape and out_big.dtype == x_big.dtype
    assert jnp.allclose(out_big, ref_big, atol=1e-6, rtol=1e-6), "big: mismatch"
    assert jnp.allclose(module.nf_fix_params["activation"]["scale"][0], ref_scale_big)

    # 3) FIX_FIXED path with a user-supplied scale (exercises clipping).
    fixed_module = ActivationFix(
        nf_fix_params={"activation": {"method": FIX_FIXED, "bitwidth": 6, "scale": 2.0}}
    )
    x_fixed = jax.random.normal(k3, (2, 8, 16, 16), dtype=jnp.float32) * 5.0
    out_fixed = jax.block_until_ready(fixed_module(x_fixed))
    ref_fixed = _reference_quant(x_fixed, jnp.float32(2.0), bitwidth=6)
    assert jnp.allclose(out_fixed, ref_fixed, atol=1e-6, rtol=1e-6), "fixed: mismatch"

    print("KERNEL_OK")
</pallas_src>

<mosaic_0001>
module attributes {stable_mosaic.version = 11 : i64} {
  func.func @_fused_small_kernel(%arg0: i32, %arg1: memref<8x512xf32, #tpu.memory_space<vmem>>, %arg2: memref<8x512xf32, #tpu.memory_space<vmem>>, %arg3: memref<1xf32, #tpu.memory_space<smem>>) attributes {dimension_semantics = [#tpu.dimension_semantics<arbitrary>], iteration_bounds = array<i64: 1>, scalar_prefetch = 0 : i64, scratch_operands = 0 : i64, tpu.core_type = #tpu.core_type<tc>, window_params = [{pipeline_mode = #tpu.pipeline_mode<synchronous>, transform_indices = @transform_0, window_bounds = array<i64: 8, 512>}, {pipeline_mode = #tpu.pipeline_mode<synchronous>, transform_indices = @transform_1, window_bounds = array<i64: 8, 512>}, {transform_indices = @transform_2, window_bounds = array<i64: 1>}]} {
    %c0 = arith.constant 0 : index
    %c0_0 = arith.constant 0 : index
    %0 = vector.load %arg1[%c0, %c0_0] : memref<8x512xf32, #tpu.memory_space<vmem>>, vector<8x512xf32>
    %1 = math.absf %0 : vector<8x512xf32>
    %2 = vector.shape_cast %1 : vector<8x512xf32> to vector<1x8x512xf32>
    %cst = arith.constant dense<0xFF800000> : vector<1xf32>
    %3 = vector.multi_reduction <maximumf>, %2, %cst [1, 2] : vector<1x8x512xf32> to vector<1xf32>
    %4 = vector.shape_cast %3 : vector<1xf32> to vector<1x1x1xf32>
    %5 = vector.extract %4[0, 0, 0] : f32 from vector<1x1x1xf32>
    %cst_1 = arith.constant 9.99999974E-6 : f32
    %6 = arith.maximumf %5, %cst_1 : f32
    %7 = math.log %6 : f32
    %cst_2 = arith.constant 2.000000e+00 : f32
    %8 = math.log %cst_2 : f32
    %9 = arith.divf %7, %8 : f32
    %10 = math.ceil %9 : f32
    %cst_3 = arith.constant 7.000000e+00 : f32
    %11 = arith.subf %10, %cst_3 : f32
    %12 = math.exp2 %11 : f32
    %cst_4 = arith.constant 7.000000e+00 : f32
    %13 = arith.subf %cst_4, %10 : f32
    %14 = math.exp2 %13 : f32
    %15 = math.exp2 %10 : f32
    %cst_5 = arith.constant 0.000000e+00 : f32
    %16 = arith.subf %cst_5, %15 : f32
    %cst_6 = arith.constant 0.000000e+00 : f32
    %17 = arith.subf %cst_6, %16 : f32
    %18 = arith.subf %17, %12 : f32
    %19 = vector.broadcast %14 : f32 to vector<8x512xf32>
    %20 = arith.mulf %0, %19 : vector<8x512xf32>
    %21 = math.roundeven %20 : vector<8x512xf32>
    %22 = vector.broadcast %12 : f32 to vector<8x512xf32>
    %23 = arith.mulf %21, %22 : vector<8x512xf32>
    %24 = vector.broadcast %16 : f32 to vector<8x512xf32>
    %25 = arith.maximumf %23, %24 : vector<8x512xf32>
    %26 = vector.broadcast %18 : f32 to vector<8x512xf32>
    %27 = arith.minimumf %25, %26 : vector<8x512xf32>
    %c0_7 = arith.constant 0 : index
    %c0_8 = arith.constant 0 : index
    %28 = vector.load %arg2[%c0_7, %c0_8] : memref<8x512xf32, #tpu.memory_space<vmem>>, vector<8x512xf32>
    tpu.vector_store %arg2[%c0_7, %c0_8], %27 {strides = array<i32>} : memref<8x512xf32, #tpu.memory_space<vmem>>, vector<8x512xf32>,
    %c0_9 = arith.constant 0 : index
    %29 = memref.load %arg3[%c0_9] : memref<1xf32, #tpu.memory_space<smem>>
    memref.store %10, %arg3[%c0_9] : memref<1xf32, #tpu.memory_space<smem>>
    return
  }
  func.func @transform_0(%arg0: i32) -> (i32, i32) {
    %c0_i32 = arith.constant 0 : i32
    %c0_i32_0 = arith.constant 0 : i32
    %c0_i32_1 = arith.constant 0 : i32
    return %c0_i32, %c0_i32_0 : i32, i32
  }
  func.func @transform_1(%arg0: i32) -> (i32, i32) {
    %c0_i32 = arith.constant 0 : i32
    %c0_i32_0 = arith.constant 0 : i32
    %c0_i32_1 = arith.constant 0 : i32
    return %c0_i32, %c0_i32_0 : i32, i32
  }
  func.func @transform_2(%arg0: i32) -> i32 {
    %c0_i32 = arith.constant 0 : i32
    %c0_i32_0 = arith.constant 0 : i32
    return %c0_i32 : i32
  }
}

</mosaic_0001>

<bundles_post_ra>
// kernel: tpu_custom_call.1
= control target key start
LH: loop header
LB: loop body
LE: loop exit
PB: predicated region body
PF: predicated region fallthrough
CT: control target
= control target key end

     0   :  { %8 = vsyncpa [#allocation3], 0  ;;  %s270_s0 = inlined_call_operand.hbm [shape: f32[8,512], index: 0, kind: input, shape index: {}]   ;;  %s271_s1 = inlined_call_operand.hbm [shape: f32[8,512], index: 1, kind: output, shape index: {0}]   ;;  %s272_s2 = inlined_call_operand.hbm [shape: f32[1], index: 2, kind: output, shape index: {1}]  }
   0x1   :  { %9 = vsyncpa [#allocation4], 0 }
   0x2   :  { %10 = vsyncpa [#allocation5], 0  ;;  %s215_s9 = smov [#allocation2]   ;;  %s152_s13 = scalar_lea.hbm %s270_s0, 512 }
   0x3   :  { %s17_s10 = sshll.u32 %s215_s9, 4  ;;  %p153_p0 = scmp.ne.s32.totalorder %s270_s0, %s152_s13  ;;  %s18_s10 = int_to_ptr.vmem [resolvable:$true] %s17_s10 }
   0x4   :  { %p156_p1 = scmp.lt.u32.totalorder %s152_s13, %s270_s0 }
   0x6   :  { %p158_p2 = pnand %p156_p1, %p153_p0 }
   0x8   :  { %161 = shalt.err (!%p158_p2)
}
   0x9   :  { %s162_s18 = scalar_lea.vmem %s18_s10, 512  ;;  %p167_p4 = scmp.lt.s32.totalorder %s18_s10, %s18_s10 }
   0xa   :  { %p163_p3 = scmp.ne.s32.totalorder %s18_s10, %s162_s18  ;;  %p168_p5 = scmp.lt.s32.totalorder %s162_s18, %s162_s18 }
   0xc   :  { %p169_p6 = por %p168_p5, %p167_p4 }
   0xe   :  { %p170_p7 = pnand %p169_p6, %p163_p3 }
  0x10   :  { %173 = shalt.err (!%p170_p7)
}
  0x11   :  { %20 = dma.hbm_to_vmem [thread:$0]  %s270_s0, 512, %s18_s10, [#allocation3]  }
  0x12   :  { %206 = dma.done.wait [#allocation3], 512  }
  0x13   :  { %207 = vsyncadd [#allocation3], 4294966784  ;;  %v24_v0 = vld [vmem:[#allocation2] sm:$0xff]  ;;  %v25_v1 = vld [vmem:[#allocation2 + $0x8] sm:$0xff]  ;;  %s216_s0 = smov 1e-05  }
  0x14   :  { %v26_v2 = vld [vmem:[#allocation2 + $0x10] sm:$0xff]  ;;  %v27_v3 = vld [vmem:[#allocation2 + $0x18] sm:$0xff]  ;;  %212 = vmaxabs.init.f32.vacc0 %v24_v0, %v25_v1  ;;  %s174_s30 = scalar_lea.hbm %s272_s2, 16 }
  0x15   :  { %p175_p8 = scmp.ne.s32.totalorder %s272_s2, %s174_s30  ;;  %p178_p9 = scmp.lt.u32.totalorder %s174_s30, %s272_s2 }
  0x16   :  { %213 = vmaxabs.f32.vacc0 %v26_v2, %v27_v3 }
  0x17   :  { %p180_p10 = pnand %p178_p9, %p175_p8 }
  0x18   :  { %v214_v4 = vmovacc.low.even.vacc0 }
  0x1a   :  { %35 = vmax.xlane.f32.xlu0 %v214_v4 }
  0xa7   :  { %v36_v5 = vpop.xlane.xlu0 %35 }
  0xa8   :  { %v37_v6 = vrot.slane %v36_v5, 4 }
  0xaa   :  { %v38_v7 = vmax.f32 %v36_v5, %v37_v6 }
  0xac   :  { %v39_v8 = vrot.slane %v38_v7, 2 }
  0xae   :  { %v40_v9 = vmax.f32 %v38_v7, %v39_v8 }
  0xb0   :  { %v41_v10 = vrot.slane %v40_v9, 1 }
  0xb2   :  { %v42_v11 = vmax.f32 %v40_v9, %v41_v10 }
  0xb4   :  { %126 = vpush %v42_v11 }
  0xe5   :  { %s127_s21 = spop %126 }
  0xe6   :  { %s44_s22 = smax.f32 %s216_s0, %s127_s21 }
  0xe7   :  { %v45_v12 = vstv %s44_s22 }
  0xe8   :  { %144 = vlog2.f32 %v45_v12 }
  0xf2   :  { %v145_v13 = vpop.eup %144 }
  0xf3   :  { %v47_v14 = vmul.f32 0.6931472, %v145_v13 }
  0xf5   :  { %128 = vpush %v47_v14 }
 0x126   :  { %s129_s23 = spop %128 }
 0x127   :  { %s51_s24 = smul.f32 1.442695, %s129_s23 }
 0x129   :  { %s52_s25 = sceil.f32 %s51_s24 }
 0x12a   :  { %s125_s26 = sadd.f32 -7.0, %s52_s25  ;;  %v61_v16 = vstv %s52_s25 }
 0x12b   :  { %s57_s27 = ssub.f32 7.0, %s52_s25 }
 0x12c   :  { %v54_v15 = vstv %s125_s26  ;;  %96 = sst [smem:[#allocation7]] %s52_s25 }
 0x12d   :  { %146 = vpow2.f32 %v54_v15  ;;  %v58_v17 = vstv %s57_s27 }
 0x12e   :  { %183 = shalt.err (!%p180_p10)
}
 0x12f   :  { %s217_s7 = smov [#allocation7]   ;;  %148 = vpow2.f32 %v58_v17  ;;  %s218_s15 = smov [#allocation6]  }
 0x130   :  { %114 = dma.smem_to_hbm %s217_s7, 16, %s272_s2, [#allocation5]   ;;  %150 = vpow2.f32 %v61_v16 }
 0x131   :  { %s103_s16 = sshll.u32 %s218_s15, 4  ;;  %s104_s16 = int_to_ptr.vmem [resolvable:$true] %s103_s16 }
 0x132   :  { %s184_s17 = scalar_lea.vmem %s104_s16, 512  ;;  %p189_p12 = scmp.lt.s32.totalorder %s104_s16, %s104_s16 }
 0x133   :  { %p185_p11 = scmp.ne.s32.totalorder %s104_s16, %s184_s17  ;;  %p190_p13 = scmp.lt.s32.totalorder %s184_s17, %s184_s17 }
 0x135   :  { %p191_p0 = por %p190_p13, %p189_p12 }
 0x137   :  { %v147_v18 = vpop.eup %146  ;;  %p192_p1 = pnand %p191_p0, %p185_p11 }
 0x138   :  { %130 = vpush %v147_v18 }
 0x139   :  { %v149_v19 = vpop.eup %148 }
 0x13a   :  { %v151_v20 = vpop.eup %150  ;;  %132 = vpush %v149_v19 }
 0x13b   :  { %134 = vpush %v151_v20 }
 0x169   :  { %s131_s10 = spop %130 }
 0x16a   :  { %v76_v30 = vstv %s131_s10 }
 0x16b   :  { %s133_s11 = spop %132 }
 0x16c   :  { %v67_v21 = vstv %s133_s11  ;;  %s135_s12 = spop %134 }
 0x16d   :  { %v68_v22 = vmul.f32 %v67_v21, %v24_v0  ;;  %v69_v23 = vmul.f32 %v67_v21, %v25_v1  ;;  %v70_v24 = vmul.f32 %v67_v21, %v26_v2  ;;  %v71_v25 = vmul.f32 %v67_v21, %v27_v3  ;;  %s64_s13 = ssub.f32 0.0, %s135_s12 }
 0x16f   :  { %v136_v26 = vround.rtne.f32 %v68_v22  ;;  %v137_v27 = vround.rtne.f32 %v69_v23  ;;  %v138_v28 = vround.rtne.f32 %v70_v24  ;;  %v139_v29 = vround.rtne.f32 %v71_v25  ;;  %s65_s2 = ssub.f32 0.0, %s64_s13 }
 0x170   :  { %v81_v35 = vstv %s64_s13 }
 0x171   :  { %v77_v31 = vmul.f32 %v136_v26, %v76_v30  ;;  %v78_v32 = vmul.f32 %v137_v27, %v76_v30  ;;  %v79_v33 = vmul.f32 %v138_v28, %v76_v30  ;;  %v80_v34 = vmul.f32 %v139_v29, %v76_v30  ;;  %s66_s14 = ssub.f32 %s65_s2, %s131_s10 }
 0x173   :  { %v82_v36 = vmax.f32 %v77_v31, %v81_v35  ;;  %v83_v37 = vmax.f32 %v78_v32, %v81_v35  ;;  %v84_v38 = vmax.f32 %v79_v33, %v81_v35  ;;  %v85_v39 = vmax.f32 %v80_v34, %v81_v35 }
 0x174   :  { %v86_v40 = vstv %s66_s14 }
 0x175   :  { %v87_v41 = vmin.f32 %v82_v36, %v86_v40  ;;  %v88_v42 = vmin.f32 %v83_v37, %v86_v40  ;;  %v89_v43 = vmin.f32 %v84_v38, %v86_v40  ;;  %v90_v44 = vmin.f32 %v85_v39, %v86_v40 }
 0x177   :  { %91 = vst [vmem:[#allocation6] sm:$0xff] %v87_v41  ;;  %92 = vst [vmem:[#allocation6 + $0x8] sm:$0xff] %v88_v42 }
 0x178   :  { %93 = vst [vmem:[#allocation6 + $0x10] sm:$0xff] %v89_v43  ;;  %94 = vst [vmem:[#allocation6 + $0x18] sm:$0xff] %v90_v44 }
 0x179   :  { %195 = shalt.err (!%p192_p1)
}
 0x17a   :  { %s196_s20 = scalar_lea.hbm %s271_s1, 512 }
 0x17b   :  { %p197_p2 = scmp.ne.s32.totalorder %s271_s1, %s196_s20  ;;  %p200_p3 = scmp.lt.u32.totalorder %s196_s20, %s271_s1 }
 0x17d   :  { %p202_p4 = pnand %p200_p3, %p197_p2 }
 0x17f   :  { %205 = shalt.err (!%p202_p4)
}
 0x180   :  { %106 = dma.vmem_to_hbm [thread:$0]  %s104_s16, 512, %s271_s1, [#allocation4]  }
 0x181   :  { %208 = dma.done.wait [#allocation4], 512  }
 0x182   :  { %209 = vsyncadd [#allocation4], 4294966784 }
 0x183   :  { %210 = dma.done.wait [#allocation5], 16  }
 0x184   :  { %211 = vsyncadd [#allocation5], 4294967280 }
 0x185   :  { %121 = sfence }
 0x186   :  { %122 = vsyncpa [#allocation3], 1 }
 0x187   :  { %123 = vsyncpa [#allocation4], 1 }
 0x188   :  { %124 = vsyncpa [#allocation5], 1 }

</bundles_post_ra>
